<compile_context>
chip_gen: v5e
topology: v5e:2x2
jax: 0.10.0
libtpu: 0.0.40
codegen_flags: <defaults>
</compile_context>

<pallas_src>
import jax
import jax.numpy as jnp
from jax.experimental import pallas as pl
from jax.experimental.pallas import tpu as pltpu

# ----------------------------------------------------------------------------
# Static configuration mirroring the PyTorch module's globals / __init__ args.
# ----------------------------------------------------------------------------
CATEGORICAL_FEATURES_INDICES = (0, 2)
NOT_CATEGORICAL_FEATURES_INDICES = (1, 3, 4, 5)
IDS = {"a": [0, 1, 2], "b": [0, 1, 2, 3, 4]}            # ids dict -> vocab = len+1
VOCAB_SIZES = tuple(len(v) + 1 for v in IDS.values())   # (4, 6)

N_FEATURES = len(CATEGORICAL_FEATURES_INDICES) + len(NOT_CATEGORICAL_FEATURES_INDICES)
HIDDEN_DIM = 32
OUTPUT_DIM = N_FEATURES        # u columns are overwritten at categorical indices

N_CAT = len(CATEGORICAL_FEATURES_INDICES)
HEAD_WIDTH = 2 * OUTPUT_DIM + sum(VOCAB_SIZES)          # 6 + 6 + 4 + 6 = 22

# Per-tile VMEM (transposed layout, f32, sublane-padded):
#   in  (8, TM)  x2 buf  =  64*TM B
#   out (24, TM) x2 buf  = 192*TM B
#   live temps (h, out, one-hots, iota) ~ 700*TM B
# TM=4096 -> ~3.5 MiB total: far below the 32 MiB scoped default on every gen
# (v5e/v6e 128 MiB physical, v7x 64 MiB physical).
TM_MAX = 4096


def _pick_tm(m, tm_max):
    """Lane-dim tile: multiple of 128, <= tm_max, and small enough that the
    grid has >= ~8 steps (so v7x's two TensorCores both get sharded work)."""
    target = -(-m // 8)                       # cdiv(m, 8)
    target = -(-target // 128) * 128          # round up to a lane multiple
    return max(128, min(tm_max, target))


# ----------------------------------------------------------------------------
# Pallas kernel: one (rows-on-lanes) tile of the whole forward pass.
# ----------------------------------------------------------------------------
def _linear_model_kernel(x_ref, w1x_ref, e0_ref, e1_ref, b1_ref, w2_ref, b2_ref,
                         out_ref):
    TM = x_ref.shape[1]
    V0, V1 = VOCAB_SIZES
    OD = OUTPUT_DIM
    CAT0, CAT1 = CATEGORICAL_FEATURES_INDICES

    xT = x_ref[...]                                               # (F, TM) f32

    # Single sublane-iota per tile, reused for both one-hots and both argmax
    # tie-breaks (JAX does not CSE broadcast_in_dim).
    iota = jax.lax.broadcasted_iota(jnp.int32, (V1, TM), 0)       # (6, TM)

    # --- categorical indices -> one-hot rows (the embedding gather happens on
    #     the MXU below); integer-valued-float inputs assumed (truncates to 0).
    idx0 = xT[CAT0:CAT0 + 1, :].astype(jnp.int32) + 1             # (1, TM)
    idx1 = xT[CAT1:CAT1 + 1, :].astype(jnp.int32) + 1
    oh0 = (iota[:V0, :] == idx0).astype(jnp.float32)              # (4, TM)
    oh1 = (iota == idx1).astype(jnp.float32)                      # (6, TM)

    # --- fused first layer (wm folded in host-side); three partial dots avoid a
    #     lane/sublane concatenate and the MXU is idle anyway.
    h = (jnp.dot(w1x_ref[...], xT, preferred_element_type=jnp.float32)
         + jnp.dot(e0_ref[...], oh0, preferred_element_type=jnp.float32)
         + jnp.dot(e1_ref[...], oh1, preferred_element_type=jnp.float32)
         + b1_ref[...])                                           # (H, TM)

    # --- fused heads [fc_u | fc_o | cat0 | cat1] in one matmul -> one 22-row slab.
    out = jnp.dot(w2_ref[...], h, preferred_element_type=jnp.float32) + b2_ref[...]

    out_ref[...] = out                                            # (22, TM), lane-dense

    # --- first-occurrence argmax per categorical head (sublane reduce over 4/6
    #     rows), scattered into u's rows of the slab via two 1-row stores.
    c0 = out[2 * OD:2 * OD + V0, :]                               # (4, TM)
    c1 = out[2 * OD + V0:2 * OD + V0 + V1, :]                     # (6, TM)

    mx0 = jnp.max(c0, axis=0, keepdims=True)
    arg0 = jnp.min(jnp.where(c0 == mx0, iota[:V0, :], V0), axis=0, keepdims=True)
    out_ref[CAT0:CAT0 + 1, :] = (arg0 - 1).astype(jnp.float32)

    mx1 = jnp.max(c1, axis=0, keepdims=True)
    arg1 = jnp.min(jnp.where(c1 == mx1, iota, V1), axis=0, keepdims=True)
    out_ref[CAT1:CAT1 + 1, :] = (arg1 - 1).astype(jnp.float32)


# ----------------------------------------------------------------------------
# Host-side algebraic weight fusion (tiny matrices, all transposed for the
# rows-on-lanes kernel layout).
# ----------------------------------------------------------------------------
def _prepare_fused_weights(params):
    wf, bf = params["feat"]            # (4, H), (1, H)
    wm, bm = params["model"]           # (H, H), (1, H)
    wu, bu = params["fc_u"]            # (H, OD), (1, OD)
    wo, bo = params["fc_o"]            # (H, OD), (1, OD)
    (wc0, bc0), (wc1, bc1) = params["cat"]
    emb0, emb1 = params["emb"]         # (V0, H), (V1, H)

    # Feature-embedding rows placed at the numeric feature columns; categorical
    # columns get zero rows so raw categorical values contribute nothing.
    wx = jnp.zeros((N_FEATURES, HIDDEN_DIM), jnp.float32)
    wx = wx.at[list(NOT_CATEGORICAL_FEATURES_INDICES), :].set(wf)

    # Fold the hidden Linear (wm, bm) in offline; transpose for (H, K) @ (K, TM).
    w1x_t = (wx @ wm).T                                  # (H, 6)
    e0_t = ((emb0 / N_CAT) @ wm).T                       # (H, 4)
    e1_t = ((emb1 / N_CAT) @ wm).T                       # (H, 6)
    b1_t = (bf @ wm + bm).T                              # (H, 1)

    # Concatenate all four heads into one (22, H) matmul.
    w2_t = jnp.concatenate([wu, wo, wc0, wc1], axis=1).T  # (22, H)
    b2_t = jnp.concatenate([bu, bo, bc0, bc1], axis=1).T  # (22, 1)
    return w1x_t, e0_t, e1_t, b1_t, w2_t, b2_t


# ----------------------------------------------------------------------------
# Wrapper: transpose (B,T,F) -> (F, M_pad), launch the lane-dense kernel,
# slice the (22, M) slab back into u / o / c.
# ----------------------------------------------------------------------------
def linear_model_forward(x, params, *, tm_max=TM_MAX):
    B, T, F = x.shape
    assert F == N_FEATURES
    M = B * T

    w1x_t, e0_t, e1_t, b1_t, w2_t, b2_t = _prepare_fused_weights(params)

    tm = _pick_tm(M, tm_max)
    m_pad = pl.cdiv(M, tm) * tm
    grid = (m_pad // tm,)

    x_flat = x.reshape(M, F).astype(jnp.float32)
    if m_pad != M:
        # Zero padding rows: categorical value 0 -> index 1 (valid), outputs discarded.
        x_flat = jnp.pad(x_flat, ((0, m_pad - M), (0, 0)))
    xT = x_flat.T                                                  # (F, M_pad)

    def full_spec(a):
        return pl.BlockSpec(a.shape, lambda i: (0, 0))   # VMEM-resident across steps

    out_slab = pl.pallas_call(
        _linear_model_kernel,
        out_shape=jax.ShapeDtypeStruct((HEAD_WIDTH, m_pad), jnp.float32),
        grid=grid,
        in_specs=[pl.BlockSpec((F, tm), lambda i: (0, i)),
                  full_spec(w1x_t), full_spec(e0_t), full_spec(e1_t),
                  full_spec(b1_t), full_spec(w2_t), full_spec(b2_t)],
        out_specs=pl.BlockSpec((HEAD_WIDTH, tm), lambda i: (0, i)),
        compiler_params=pltpu.CompilerParams(
            dimension_semantics=("parallel",),
            vmem_limit_bytes=32 * 1024 * 1024),
    )(xT, w1x_t, e0_t, e1_t, b1_t, w2_t, b2_t)

    out = out_slab[:, :M].T                                        # (M, 22)
    OD = OUTPUT_DIM
    V0, V1 = VOCAB_SIZES
    u = out[:, 0:OD].reshape(B, T, OD)
    o = out[:, OD:2 * OD].reshape(B, T, OD)
    c = [out[:, 2 * OD:2 * OD + V0].reshape(B, T, V0),
         out[:, 2 * OD + V0:2 * OD + V0 + V1].reshape(B, T, V1)]
    return u, o, c


# ----------------------------------------------------------------------------
# Deterministic parameter init (synthetic weights; Linear stored as (in, out)).
# ----------------------------------------------------------------------------
def init_params(key):
    ks = jax.random.split(key, 16)

    def lin(kw, kb, fan_in, fan_out):
        w = jax.random.normal(kw, (fan_in, fan_out), jnp.float32) * 0.1
        b = jax.random.normal(kb, (1, fan_out), jnp.float32) * 0.1
        return w, b

    return {
        "emb": [jax.random.normal(ks[i], (VOCAB_SIZES[i], HIDDEN_DIM), jnp.float32) * 0.1
                for i in range(2)],
        "feat": lin(ks[2], ks[3], len(NOT_CATEGORICAL_FEATURES_INDICES), HIDDEN_DIM),
        "model": lin(ks[4], ks[5], HIDDEN_DIM, HIDDEN_DIM),
        "fc_u": lin(ks[6], ks[7], HIDDEN_DIM, OUTPUT_DIM),
        "fc_o": lin(ks[8], ks[9], HIDDEN_DIM, OUTPUT_DIM),
        "cat": [lin(ks[10 + 2 * i], ks[11 + 2 * i], HIDDEN_DIM, VOCAB_SIZES[i])
                for i in range(2)],
    }


# ----------------------------------------------------------------------------
# Pure-JAX reference of the PyTorch forward, for a correctness check.
# ----------------------------------------------------------------------------
def reference_forward(x, params):
    x_cat = jnp.zeros(x.shape[:2] + (HIDDEN_DIM,), jnp.float32)
    for i, ind in enumerate(CATEGORICAL_FEATURES_INDICES):
        idx = x[:, :, ind].astype(jnp.int32) + 1
        x_cat = x_cat + params["emb"][i][idx] / N_CAT
    xn = x[:, :, list(NOT_CATEGORICAL_FEATURES_INDICES)]
    h = x_cat + xn @ params["feat"][0] + params["feat"][1][0]
    h = h @ params["model"][0] + params["model"][1][0]
    u = h @ params["fc_u"][0] + params["fc_u"][1][0]
    o = h @ params["fc_o"][0] + params["fc_o"][1][0]
    c = []
    for i in range(N_CAT):
        c_x = h @ params["cat"][i][0] + params["cat"][i][1][0]
        c.append(c_x)
        u = u.at[:, :, CATEGORICAL_FEATURES_INDICES[i]].set(
            (jnp.argmax(c_x, axis=2) - 1).astype(jnp.float32))
    return u, o, c


if __name__ == "__main__":
    key = jax.random.PRNGKey(0)
    kp, kx_num, kx_c0, kx_c1 = jax.random.split(key, 4)
    params = init_params(kp)

    B, T = 2, 8
    x = jnp.zeros((B, T, N_FEATURES), jnp.float32)
    # numeric feature columns
    x_num_vals = jax.random.normal(kx_num, (B, T, len(NOT_CATEGORICAL_FEATURES_INDICES)))
    for j, col in enumerate(NOT_CATEGORICAL_FEATURES_INDICES):
        x = x.at[:, :, col].set(x_num_vals[:, :, j])
    # categorical feature columns: raw values in [-1, len(id)-1] so (val+1) is a valid row
    cat_keys = (kx_c0, kx_c1)
    for i, col in enumerate(CATEGORICAL_FEATURES_INDICES):
        hi = len(list(IDS.values())[i])
        vals = jax.random.randint(cat_keys[i], (B, T), -1, hi).astype(jnp.float32)
        x = x.at[:, :, col].set(vals)

    u, o, c = linear_model_forward(x, params)
    jax.block_until_ready((u, o, c))

    u_r, o_r, c_r = reference_forward(x, params)
    assert u.shape == (B, T, OUTPUT_DIM) and o.shape == (B, T, OUTPUT_DIM)
    assert jnp.allclose(u, u_r, atol=1e-4, rtol=1e-4)
    assert jnp.allclose(o, o_r, atol=1e-4, rtol=1e-4)
    for ci, cri in zip(c, c_r):
        assert jnp.allclose(ci, cri, atol=1e-4, rtol=1e-4)

    print("KERNEL_OK")
</pallas_src>

<mosaic_0001>
module attributes {stable_mosaic.version = 11 : i64} {
  func.func @_linear_model_kernel(%arg0: i32, %arg1: memref<6x128xf32, #tpu.memory_space<vmem>>, %arg2: memref<32x6xf32, #tpu.memory_space<vmem>>, %arg3: memref<32x4xf32, #tpu.memory_space<vmem>>, %arg4: memref<32x6xf32, #tpu.memory_space<vmem>>, %arg5: memref<32x1xf32, #tpu.memory_space<vmem>>, %arg6: memref<22x32xf32, #tpu.memory_space<vmem>>, %arg7: memref<22x1xf32, #tpu.memory_space<vmem>>, %arg8: memref<22x128xf32, #tpu.memory_space<vmem>>) attributes {dimension_semantics = [#tpu.dimension_semantics<parallel>], iteration_bounds = array<i64: 1>, scalar_prefetch = 0 : i64, scratch_operands = 0 : i64, tpu.core_type = #tpu.core_type<tc>, window_params = [{transform_indices = @transform_0, window_bounds = array<i64: 6, 128>}, {pipeline_mode = #tpu.pipeline_mode<synchronous>, transform_indices = @transform_1, window_bounds = array<i64: 32, 6>}, {pipeline_mode = #tpu.pipeline_mode<synchronous>, transform_indices = @transform_2, window_bounds = array<i64: 32, 4>}, {pipeline_mode = #tpu.pipeline_mode<synchronous>, transform_indices = @transform_3, window_bounds = array<i64: 32, 6>}, {pipeline_mode = #tpu.pipeline_mode<synchronous>, transform_indices = @transform_4, window_bounds = array<i64: 32, 1>}, {pipeline_mode = #tpu.pipeline_mode<synchronous>, transform_indices = @transform_5, window_bounds = array<i64: 22, 32>}, {pipeline_mode = #tpu.pipeline_mode<synchronous>, transform_indices = @transform_6, window_bounds = array<i64: 22, 1>}, {transform_indices = @transform_7, window_bounds = array<i64: 22, 128>}]} {
    %c0 = arith.constant 0 : index
    %c0_0 = arith.constant 0 : index
    %0 = vector.load %arg1[%c0, %c0_0] : memref<6x128xf32, #tpu.memory_space<vmem>>, vector<6x128xf32>
    %1 = tpu.iota {dimensions = array<i32: 0>} : vector<6x128xi32>
    %2 = vector.extract_strided_slice %0 {offsets = [0, 0], sizes = [1, 128], strides = [1, 1]} : vector<6x128xf32> to vector<1x128xf32>
    %3 = arith.fptosi %2 : vector<1x128xf32> to vector<1x128xi32>
    %c1_i32 = arith.constant 1 : i32
    %4 = vector.broadcast %c1_i32 : i32 to vector<1x128xi32>
    %5 = arith.addi %3, %4 : vector<1x128xi32>
    %6 = vector.extract_strided_slice %0 {offsets = [2, 0], sizes = [1, 128], strides = [1, 1]} : vector<6x128xf32> to vector<1x128xf32>
    %7 = arith.fptosi %6 : vector<1x128xf32> to vector<1x128xi32>
    %c1_i32_1 = arith.constant 1 : i32
    %8 = vector.broadcast %c1_i32_1 : i32 to vector<1x128xi32>
    %9 = arith.addi %7, %8 : vector<1x128xi32>
    %10 = vector.extract_strided_slice %1 {offsets = [0, 0], sizes = [4, 128], strides = [1, 1]} : vector<6x128xi32> to vector<4x128xi32>
    %11 = vector.broadcast %5 : vector<1x128xi32> to vector<4x128xi32>
    %12 = arith.cmpi eq, %10, %11 : vector<4x128xi32>
    %13 = arith.extui %12 : vector<4x128xi1> to vector<4x128xi32>
    %14 = arith.sitofp %13 : vector<4x128xi32> to vector<4x128xf32>
    %15 = vector.broadcast %9 : vector<1x128xi32> to vector<6x128xi32>
    %16 = arith.cmpi eq, %1, %15 : vector<6x128xi32>
    %17 = arith.extui %16 : vector<6x128xi1> to vector<6x128xi32>
    %18 = arith.sitofp %17 : vector<6x128xi32> to vector<6x128xf32>
    %c0_2 = arith.constant 0 : index
    %c0_3 = arith.constant 0 : index
    %19 = vector.load %arg2[%c0_2, %c0_3] : memref<32x6xf32, #tpu.memory_space<vmem>>, vector<32x6xf32>
    %cst = arith.constant dense<0.000000e+00> : vector<32x128xf32>
    %20 = tpu.matmul %19, %0, %cst {dimension_numbers = #tpu.dot_dimension_numbers<[1], [0], [0], [1], [0, 0, 1, 1], [], []>} : vector<32x6xf32>, vector<6x128xf32>, vector<32x128xf32> -> vector<32x128xf32>
    %c0_4 = arith.constant 0 : index
    %c0_5 = arith.constant 0 : index
    %21 = vector.load %arg3[%c0_4, %c0_5] : memref<32x4xf32, #tpu.memory_space<vmem>>, vector<32x4xf32>
    %cst_6 = arith.constant dense<0.000000e+00> : vector<32x128xf32>
    %22 = tpu.matmul %21, %14, %cst_6 {dimension_numbers = #tpu.dot_dimension_numbers<[1], [0], [0], [1], [0, 0, 1, 1], [], []>} : vector<32x4xf32>, vector<4x128xf32>, vector<32x128xf32> -> vector<32x128xf32>
    %23 = arith.addf %20, %22 : vector<32x128xf32>
    %c0_7 = arith.constant 0 : index
    %c0_8 = arith.constant 0 : index
    %24 = vector.load %arg4[%c0_7, %c0_8] : memref<32x6xf32, #tpu.memory_space<vmem>>, vector<32x6xf32>
    %cst_9 = arith.constant dense<0.000000e+00> : vector<32x128xf32>
    %25 = tpu.matmul %24, %18, %cst_9 {dimension_numbers = #tpu.dot_dimension_numbers<[1], [0], [0], [1], [0, 0, 1, 1], [], []>} : vector<32x6xf32>, vector<6x128xf32>, vector<32x128xf32> -> vector<32x128xf32>
    %26 = arith.addf %23, %25 : vector<32x128xf32>
    %c0_10 = arith.constant 0 : index
    %c0_11 = arith.constant 0 : index
    %27 = vector.load %arg5[%c0_10, %c0_11] : memref<32x1xf32, #tpu.memory_space<vmem>>, vector<32x1xf32>
    %28 = vector.broadcast %27 : vector<32x1xf32> to vector<32x128xf32>
    %29 = arith.addf %26, %28 : vector<32x128xf32>
    %c0_12 = arith.constant 0 : index
    %c0_13 = arith.constant 0 : index
    %30 = vector.load %arg6[%c0_12, %c0_13] : memref<22x32xf32, #tpu.memory_space<vmem>>, vector<22x32xf32>
    %cst_14 = arith.constant dense<0.000000e+00> : vector<22x128xf32>
    %31 = tpu.matmul %30, %29, %cst_14 {dimension_numbers = #tpu.dot_dimension_numbers<[1], [0], [0], [1], [0, 0, 1, 1], [], []>} : vector<22x32xf32>, vector<32x128xf32>, vector<22x128xf32> -> vector<22x128xf32>
    %c0_15 = arith.constant 0 : index
    %c0_16 = arith.constant 0 : index
    %32 = vector.load %arg7[%c0_15, %c0_16] : memref<22x1xf32, #tpu.memory_space<vmem>>, vector<22x1xf32>
    %33 = vector.broadcast %32 : vector<22x1xf32> to vector<22x128xf32>
    %34 = arith.addf %31, %33 : vector<22x128xf32>
    %c0_17 = arith.constant 0 : index
    %c0_18 = arith.constant 0 : index
    %35 = vector.load %arg8[%c0_17, %c0_18] : memref<22x128xf32, #tpu.memory_space<vmem>>, vector<22x128xf32>
    tpu.vector_store %arg8[%c0_17, %c0_18], %34 {strides = array<i32>} : memref<22x128xf32, #tpu.memory_space<vmem>>, vector<22x128xf32>,
    %36 = vector.extract_strided_slice %34 {offsets = [12, 0], sizes = [4, 128], strides = [1, 1]} : vector<22x128xf32> to vector<4x128xf32>
    %37 = vector.extract_strided_slice %34 {offsets = [16, 0], sizes = [6, 128], strides = [1, 1]} : vector<22x128xf32> to vector<6x128xf32>
    %cst_19 = arith.constant dense<0xFF800000> : vector<128xf32>
    %38 = vector.multi_reduction <maximumf>, %36, %cst_19 [0] : vector<4x128xf32> to vector<128xf32>
    %39 = vector.shape_cast %38 : vector<128xf32> to vector<1x128xf32>
    %40 = vector.broadcast %39 : vector<1x128xf32> to vector<4x128xf32>
    %41 = arith.cmpf oeq, %36, %40 : vector<4x128xf32>
    %42 = vector.extract_strided_slice %1 {offsets = [0, 0], sizes = [4, 128], strides = [1, 1]} : vector<6x128xi32> to vector<4x128xi32>
    %c4_i32 = arith.constant 4 : i32
    %43 = vector.broadcast %c4_i32 : i32 to vector<4x128xi32>
    %44 = arith.select %41, %42, %43 : vector<4x128xi1>, vector<4x128xi32>
    %cst_20 = arith.constant dense<2147483647> : vector<128xi32>
    %45 = vector.multi_reduction <minsi>, %44, %cst_20 [0] : vector<4x128xi32> to vector<128xi32>
    %46 = vector.shape_cast %45 : vector<128xi32> to vector<1x128xi32>
    %c1_i32_21 = arith.constant 1 : i32
    %47 = vector.broadcast %c1_i32_21 : i32 to vector<1x128xi32>
    %48 = arith.subi %46, %47 : vector<1x128xi32>
    %49 = arith.sitofp %48 : vector<1x128xi32> to vector<1x128xf32>
    %c0_22 = arith.constant 0 : index
    %c0_23 = arith.constant 0 : index
    %50 = vector.load %arg8[%c0_22, %c0_23] : memref<22x128xf32, #tpu.memory_space<vmem>>, vector<1x128xf32>
    tpu.vector_store %arg8[%c0_22, %c0_23], %49 {strides = array<i32>} : memref<22x128xf32, #tpu.memory_space<vmem>>, vector<1x128xf32>,
    %cst_24 = arith.constant dense<0xFF800000> : vector<128xf32>
    %51 = vector.multi_reduction <maximumf>, %37, %cst_24 [0] : vector<6x128xf32> to vector<128xf32>
    %52 = vector.shape_cast %51 : vector<128xf32> to vector<1x128xf32>
    %53 = vector.broadcast %52 : vector<1x128xf32> to vector<6x128xf32>
    %54 = arith.cmpf oeq, %37, %53 : vector<6x128xf32>
    %c6_i32 = arith.constant 6 : i32
    %55 = vector.broadcast %c6_i32 : i32 to vector<6x128xi32>
    %56 = arith.select %54, %1, %55 : vector<6x128xi1>, vector<6x128xi32>
    %cst_25 = arith.constant dense<2147483647> : vector<128xi32>
    %57 = vector.multi_reduction <minsi>, %56, %cst_25 [0] : vector<6x128xi32> to vector<128xi32>
    %58 = vector.shape_cast %57 : vector<128xi32> to vector<1x128xi32>
    %c1_i32_26 = arith.constant 1 : i32
    %59 = vector.broadcast %c1_i32_26 : i32 to vector<1x128xi32>
    %60 = arith.subi %58, %59 : vector<1x128xi32>
    %61 = arith.sitofp %60 : vector<1x128xi32> to vector<1x128xf32>
    %c2 = arith.constant 2 : index
    %c0_27 = arith.constant 0 : index
    %62 = vector.load %arg8[%c2, %c0_27] : memref<22x128xf32, #tpu.memory_space<vmem>>, vector<1x128xf32>
    tpu.vector_store %arg8[%c2, %c0_27], %61 {strides = array<i32>} : memref<22x128xf32, #tpu.memory_space<vmem>>, vector<1x128xf32>,
    return
  }
  func.func @transform_0(%arg0: i32) -> (i32, i32) {
    %c0_i32 = arith.constant 0 : i32
    %c0_i32_0 = arith.constant 0 : i32
    return %c0_i32, %arg0 : i32, i32
  }
  func.func @transform_1(%arg0: i32) -> (i32, i32) {
    %c0_i32 = arith.constant 0 : i32
    %c0_i32_0 = arith.constant 0 : i32
    %c0_i32_1 = arith.constant 0 : i32
    return %c0_i32, %c0_i32_0 : i32, i32
  }
  func.func @transform_2(%arg0: i32) -> (i32, i32) {
    %c0_i32 = arith.constant 0 : i32
    %c0_i32_0 = arith.constant 0 : i32
    %c0_i32_1 = arith.constant 0 : i32
    return %c0_i32, %c0_i32_0 : i32, i32
  }
  func.func @transform_3(%arg0: i32) -> (i32, i32) {
    %c0_i32 = arith.constant 0 : i32
    %c0_i32_0 = arith.constant 0 : i32
    %c0_i32_1 = arith.constant 0 : i32
    return %c0_i32, %c0_i32_0 : i32, i32
  }
  func.func @transform_4(%arg0: i32) -> (i32, i32) {
    %c0_i32 = arith.constant 0 : i32
    %c0_i32_0 = arith.constant 0 : i32
    %c0_i32_1 = arith.constant 0 : i32
    return %c0_i32, %c0_i32_0 : i32, i32
  }
  func.func @transform_5(%arg0: i32) -> (i32, i32) {
    %c0_i32 = arith.constant 0 : i32
    %c0_i32_0 = arith.constant 0 : i32
    %c0_i32_1 = arith.constant 0 : i32
    return %c0_i32, %c0_i32_0 : i32, i32
  }
  func.func @transform_6(%arg0: i32) -> (i32, i32) {
    %c0_i32 = arith.constant 0 : i32
    %c0_i32_0 = arith.constant 0 : i32
    %c0_i32_1 = arith.constant 0 : i32
    return %c0_i32, %c0_i32_0 : i32, i32
  }
  func.func @transform_7(%arg0: i32) -> (i32, i32) {
    %c0_i32 = arith.constant 0 : i32
    %c0_i32_0 = arith.constant 0 : i32
    return %c0_i32, %arg0 : i32, i32
  }
}

</mosaic_0001>

<bundles_post_ra>
// kernel: tpu_custom_call.1
= control target key start
LH: loop header
LB: loop body
LE: loop exit
PB: predicated region body
PF: predicated region fallthrough
CT: control target
= control target key end

     0   :  { %vm107_vm0 = vcmask 1045504   ;;  %vm94_vm2 = vcmask 48128   ;;  %v28_v4 = vlaneseq  ;;  %v405_v7 = vmov 0   ;;  %s546_s0 = inlined_call_operand.vmem [shape: f32[6,128], index: 0, kind: input, shape index: {}]   ;;  %s547_s1 = inlined_call_operand.vmem [shape: f32[32,6], index: 1, kind: input, shape index: {}]   ;;  %s548_s2 = inlined_call_operand.vmem [shape: f32[32,4], index: 2, kind: input, shape index: {}]   ;;  %s549_s3 = inlined_call_operand.vmem [shape: f32[32,6], index: 3, kind: input, shape index: {}]   ;;  %s550_s4 = inlined_call_operand.vmem [shape: f32[32,1], index: 4, kind: input, shape index: {}]   ;;  %s551_s5 = inlined_call_operand.vmem [shape: f32[22,32], index: 5, kind: input, shape index: {}]   ;;  %s552_s6 = inlined_call_operand.vmem [shape: f32[22,1], index: 6, kind: input, shape index: {}]   ;;  %s553_s7 = inlined_call_operand.hbm [shape: f32[22,128], index: 7, kind: output, shape index: {}]  }
   0x1   :  { %v27_v0 = vld [vmem:[%s546_s0] sm:$0x3f]  ;;  %v193_v5 = vld [vmem:[%s550_s4 + $0x8] sm:$0xff]  ;;  %377 = vset.pattern.permute.xlu1 %v405_v7  ;;  %376 = vset.pattern.permute.xlu0 %v405_v7  ;;  %v195_v9 = vld [vmem:[%s550_s4 + $0x18] sm:$0xff] }
   0x2   :  { %vm366_vm1 = vcmp.lt.s32.totalorder %v27_v0, 0  ;;  %v367_v1 = vceil.f32 %v27_v0  ;;  %v368_v2 = vfloor.f32 %v27_v0  ;;  %351 = vmatpush.msk.msra.mxu1 %vm107_vm0, %v27_v0  ;;  %v40_v3 = vld [vmem:[%s547_s1] sm:$0xff]  ;;  %203 = vperm.xlu1 %377, %v193_v5   ;;  %v464_v10 = vshrl.u32 %v28_v4, 7 }
   0x3   :  { %352 = vmatmul.msk.f32.vlgmr.msra.gmra.mxu1 %vm94_vm2, %v40_v3  ;;  %378 = vset.pattern.permute.xlu2 %v405_v7 }
   0x4   :  { %v369_v6 = vsel %vm366_vm1, %v367_v1, %v368_v2  ;;  %213 = vperm.xlu0 %376, %v195_v9  }
   0x5   :  { %v370_v8 = vcvt.f32.s32 %v369_v6 }
   0x7   :  { %v31_v11 = vadd.s32 1, %v370_v8 }
   0x8   :  { %12 = vsyncpa [#allocation3], 0  ;;  %v41_v12 = vld [vmem:[%s547_s1 + $0x8] sm:$0xff]  ;;  %vm61_vm3 = vcmask 1043456   ;;  %v140_v15 = vld [vmem:[%s549_s3] sm:$0xff]  ;;  %vm48_vm6 = vcmask 31744  }
   0x9   :  { %v36_v13 = vperm.slane %v31_v11, 2  ;;  %v32_v14 = vperm.slane %v31_v11, 0  ;;  %v44_v16 = vld [vmem:[%s548_s2] sm:$0xff]  ;;  %v406_v17 = vmov 0.0   ;;  %v194_v21 = vld [vmem:[%s550_s4 + $0x10] sm:$0xff]  ;;  %v141_v23 = vld [vmem:[%s549_s3 + $0x8] sm:$0xff] }
   0xa   :  { %v192_v20 = vld [vmem:[%s550_s4] sm:$0xff]  ;;  %v42_v22 = vld [vmem:[%s547_s1 + $0x10] sm:$0xff]  ;;  %v45_v24 = vld [vmem:[%s548_s2 + $0x8] sm:$0xff]  ;;  %vm241_vm7 = vcmask 261120   ;;  %vm280_vm8 = vcmask 1047556   ;;  %s332_s20 = sshll.u32 %s553_s7, 4  ;;  %s333_s20 = int_to_ptr.hbm [resolvable:$true] %s332_s20 }
   0xb   :  { %vm37_vm4 = vcmp.eq.s32.totalorder %v464_v10, %v36_v13  ;;  %vm33_vm5 = vcmp.eq.s32.totalorder %v464_v10, %v32_v14  ;;  %353 = vmatmul.msk.f32.gmra.mxu1 %vm94_vm2, %v41_v12  ;;  %198 = vperm.xlu1 %377, %v192_v20   ;;  %v223_v25 = vld [vmem:[%s552_s6] sm:$0xff]  ;;  %v43_v26 = vld [vmem:[%s547_s1 + $0x18] sm:$0xff]  ;;  %v142_v27 = vld [vmem:[%s549_s3 + $0x10] sm:$0xff]  ;;  %s408_s21 = smov 128   ;;  %s409_s22 = smov 8  }
   0xc   :  { %v345_v18 = vsel %vm37_vm4, 1.0, %v406_v17  ;;  %v344_v19 = vsel %vm33_vm5, 1.0, %v406_v17  ;;  %208 = vperm.xlu0 %376, %v194_v21   ;;  %v46_v28 = vld [vmem:[%s548_s2 + $0x10] sm:$0xff]  ;;  %v143_v29 = vld [vmem:[%s549_s3 + $0x18] sm:$0xff]  ;;  %v224_v44 = vld [vmem:[%s552_s6 + $0x8] sm:$0xff] }
   0xd   :  { %356 = vmatpush.msk.msra.mxu2 %vm107_vm0, %v345_v18  ;;  %346 = vmatpush.msk.msra.mxu0 %vm61_vm3, %v344_v19  ;;  %v47_v30 = vld [vmem:[%s548_s2 + $0x18] sm:$0xff]  ;;  %v225_v52 = vld [vmem:[%s552_s6 + $0x10] sm:$0x3f]  ;;  %v220_v61 = vld [vmem:[%s551_s5] sm:$0xff]  ;;  %v289_v18 = vrot.slane %v464_v10, 4 }
   0xe   :  { %357 = vmatmul.msk.f32.vlgmr.msra.gmra.mxu2 %vm94_vm2, %v140_v15  ;;  %347 = vmatmul.msk.f32.vlgmr.msra.gmra.mxu0 %vm48_vm6, %v44_v16  ;;  %v221_v62 = vld [vmem:[%s551_s5 + $0x8] sm:$0xff]  ;;  %v222_v63 = vld [vmem:[%s551_s5 + $0x10] sm:$0x3f]  ;;  %s407_s5 = smov [#allocation2]  }
   0xf   :  { %233 = vperm.xlu2 %378, %v224_v44   ;;  %s330_s17 = sshll.u32 %s407_s5, 4  ;;  %s331_s17 = int_to_ptr.vmem [resolvable:$true] %s330_s17 }
  0x13   :  { %354 = vmatmul.msk.f32.gmra.mxu1 %vm94_vm2, %v42_v22 }
  0x14   :  { %228 = vperm.xlu0 %376, %v223_v25  }
  0x16   :  { %358 = vmatmul.msk.f32.gmra.mxu2 %vm94_vm2, %v141_v23  ;;  %348 = vmatmul.msk.f32.gmra.mxu0 %vm48_vm6, %v45_v24 }
  0x17   :  { %238 = vperm.xlu2 %378, %v225_v52  }
  0x1b   :  { %355 = vmatmul.msk.f32.gmra.mxu1 %vm94_vm2, %v43_v26 }
  0x1e   :  { %359 = vmatmul.msk.f32.gmra.mxu2 %vm94_vm2, %v142_v27  ;;  %349 = vmatmul.msk.f32.gmra.mxu0 %vm48_vm6, %v46_v28 }
  0x26   :  { %360 = vmatmul.msk.f32.gmra.mxu2 %vm94_vm2, %v143_v29  ;;  %350 = vmatmul.msk.f32.gmra.mxu0 %vm48_vm6, %v47_v30 }
  0x69   :  { %v234_v3 = vpop.permute.xlu2 %233 }
  0x71   :  { %v239_v9 = vpop.permute.xlu2 %238 }
  0x74   :  { %v204_v43 = vpop.permute.xlu1 %203 }
  0x76   :  { %v214_v40 = vpop.permute.xlu0 %213 }
  0x7d   :  { %v199_v58 = vpop.permute.xlu1 %198 }
  0x7e   :  { %v209_v55 = vpop.permute.xlu0 %208 }
  0x80   :  { %v128_v31 = vpop.f32.mrf.mxu1 }
  0x86   :  { %v229_v0 = vpop.permute.xlu0 %228 }
  0x88   :  { %v131_v33 = vpop.f32.mrf.mxu1 }
  0x8b   :  { %v82_v32 = vpop.f32.mrf.mxu0 }
  0x8c   :  { %v129_v49 = vadd.f32 %v128_v31, %v82_v32 }
  0x90   :  { %v134_v37 = vpop.f32.mrf.mxu1 }
  0x91   :  { %v176_v34 = vpop.f32.mrf.mxu2 }
  0x92   :  { %v188_v56 = vadd.f32 %v176_v34, %v129_v49 }
  0x93   :  { %v85_v35 = vpop.f32.mrf.mxu0 }
  0x94   :  { %v132_v47 = vadd.f32 %v131_v33, %v85_v35  ;;  %v216_v60 = vadd.f32 %v199_v58, %v188_v56 }
  0x98   :  { %v137_v42 = vpop.f32.mrf.mxu1 }
  0x99   :  { %v179_v36 = vpop.f32.mrf.mxu2 }
  0x9a   :  { %v189_v53 = vadd.f32 %v179_v36, %v132_v47 }
  0x9b   :  { %v88_v38 = vpop.f32.mrf.mxu0 }
  0x9c   :  { %v135_v45 = vadd.f32 %v134_v37, %v88_v38  ;;  %v217_v59 = vadd.f32 %v204_v43, %v189_v53 }
  0xa1   :  { %v182_v39 = vpop.f32.mrf.mxu2 }
  0xa2   :  { %v190_v50 = vadd.f32 %v182_v39, %v135_v45 }
  0xa3   :  { %v91_v41 = vpop.f32.mrf.mxu0 }
  0xa4   :  { %v138_v46 = vadd.f32 %v137_v42, %v91_v41  ;;  %v218_v57 = vadd.f32 %v209_v55, %v190_v50 }
  0xa9   :  { %v185_v48 = vpop.f32.mrf.mxu2 }
  0xaa   :  { %v191_v51 = vadd.f32 %v185_v48, %v138_v46 }
  0xac   :  { %v219_v54 = vadd.f32 %v214_v40, %v191_v51 }
  0xae   :  { %263 = vmatpush.msra.mxu3 %v219_v54 }
  0xb0   :  { %264 = vmatpush.msra.mxu3 %v218_v57 }
  0xb2   :  { %265 = vmatpush.msra.mxu3 %v217_v59 }
  0xb4   :  { %266 = vmatpush.msra.mxu3 %v216_v60 }
  0xb5   :  { %361 = vmatmul.msk.f32.vlgmr.msra.gmra.mxu3 %vm241_vm7, %v220_v61 }
  0xbd   :  { %362 = vmatmul.msk.f32.gmra.mxu3 %vm241_vm7, %v221_v62 }
  0xc5   :  { %363 = vmatmul.msk.f32.gmra.mxu3 %vm241_vm7, %v222_v63 }
 0x138   :  { %v268_v1 = vpop.f32.mrf.mxu3 }
 0x139   :  { %v269_v2 = vadd.f32 %v268_v1, %v229_v0 }
 0x13b   :  { %277 = vst [vmem:[#allocation2] sm:$0xff] %v269_v2 }
 0x140   :  { %v271_v4 = vpop.f32.mrf.mxu3 }
 0x141   :  { %v272_v5 = vadd.f32 %v271_v4, %v234_v3 }
 0x143   :  { %278 = vst [vmem:[#allocation2 + $0x8] sm:$0xff] %v272_v5  ;;  %v281_v6 = vsel %vm280_vm8, %v272_v5, -inf }
 0x144   :  { %v282_v7 = vrot.slane %v281_v6, 4 }
 0x146   :  { %v283_v8 = vmax.f32 %v281_v6, %v282_v7 }
 0x148   :  { %v284_v11 = vrot.slane %v283_v8, 2  ;;  %v274_v12 = vpop.f32.mrf.mxu3 }
 0x149   :  { %v275_v13 = vadd.f32 %v274_v12, %v239_v9 }
 0x14a   :  { %v285_v14 = vmax.f32 %v283_v8, %v284_v11 }
 0x14b   :  { %279 = vst [vmem:[#allocation2 + $0x10] sm:$0x3f] %v275_v13  ;;  %v304_v15 = vsel %vm107_vm0, %v275_v13, -inf }
 0x14c   :  { %v286_v16 = vrot.slane %v285_v14, 1  ;;  %v305_v17 = vrot.slane %v304_v15, 4 }
 0x14e   :  { %v287_v19 = vmax.f32 %v285_v14, %v286_v16  ;;  %v306_v20 = vmax.f32 %v304_v15, %v305_v17 }
 0x150   :  { %vm288_vm9 = vcmp.eq.f32.partialorder %v272_v5, %v287_v19  ;;  %v307_v21 = vrot.slane %v306_v20, 2 }
 0x151   :  { %v290_v22 = vsel %vm288_vm9, %v289_v18, 4 }
 0x152   :  { %v291_v23 = vsel %vm280_vm8, %v290_v22, 2147483647  ;;  %v308_v24 = vmax.f32 %v306_v20, %v307_v21 }
 0x153   :  { %v292_v25 = vrot.slane %v291_v23, 4 }
 0x154   :  { %v309_v26 = vrot.slane %v308_v24, 1 }
 0x155   :  { %vm293_vm10 = vcmp.lt.s32.totalorder %v291_v23, %v292_v25 }
 0x156   :  { %v294_v27 = vsel %vm293_vm10, %v291_v23, %v292_v25  ;;  %v310_v28 = vmax.f32 %v308_v24, %v309_v26 }
 0x157   :  { %v295_v29 = vrot.slane %v294_v27, 2 }
 0x158   :  { %vm311_vm11 = vcmp.eq.f32.partialorder %v275_v13, %v310_v28 }
 0x159   :  { %vm296_vm12 = vcmp.lt.s32.totalorder %v294_v27, %v295_v29  ;;  %v312_v30 = vsel %vm311_vm11, %v464_v10, 6 }
 0x15a   :  { %v297_v31 = vsel %vm296_vm12, %v294_v27, %v295_v29  ;;  %v313_v32 = vsel %vm107_vm0, %v312_v30, 2147483647 }
 0x15b   :  { %v298_v33 = vrot.slane %v297_v31, 1  ;;  %v314_v34 = vrot.slane %v313_v32, 4 }
 0x15d   :  { %vm299_vm13 = vcmp.lt.s32.totalorder %v297_v31, %v298_v33  ;;  %vm315_vm14 = vcmp.lt.s32.totalorder %v313_v32, %v314_v34 }
 0x15e   :  { %v300_v35 = vsel %vm299_vm13, %v297_v31, %v298_v33  ;;  %v316_v36 = vsel %vm315_vm14, %v313_v32, %v314_v34 }
 0x15f   :  { %v364_v37 = vadd.s32 4294967295, %v300_v35  ;;  %v317_v38 = vrot.slane %v316_v36, 2 }
 0x161   :  { %v302_v39 = vcvt.s32.f32 %v364_v37  ;;  %vm318_vm15 = vcmp.lt.s32.totalorder %v316_v36, %v317_v38 }
 0x162   :  { %v319_v40 = vsel %vm318_vm15, %v316_v36, %v317_v38 }
 0x163   :  { %303 = vst [vmem:[#allocation2] sm:$0x1] %v302_v39  ;;  %v320_v41 = vrot.slane %v319_v40, 1 }
 0x165   :  { %vm321_vm1 = vcmp.lt.s32.totalorder %v319_v40, %v320_v41 }
 0x166   :  { %v322_v10 = vsel %vm321_vm1, %v319_v40, %v320_v41 }
 0x167   :  { %v365_v42 = vadd.s32 4294967295, %v322_v10 }
 0x169   :  { %v324_v43 = vcvt.s32.f32 %v365_v42 }
 0x16b   :  { %325 = vst [vmem:[#allocation2 + $0x2] sm:$0x1] %v324_v43 }
 0x16c   :  { %338 = dma.vmem_to_hbm [thread:$0]  %s331_s17, 384, %s333_s20, [#allocation3], %s408_s21, %s408_s21, %s409_s22  }
 0x16d   :  { %403 = dma.done.wait [#allocation3], 384  }
 0x16e   :  { %404 = vsyncadd [#allocation3], 4294966912 }
 0x16f   :  { %343 = vsyncpa [#allocation3], 1 }

</bundles_post_ra>
